<compile_context>
chip_gen: v7x
topology: tpu7x:2x2x1
jax: 0.10.0
libtpu: 0.0.40
codegen_flags: <defaults>
</compile_context>

<pallas_src>
from functools import partial

import jax
import jax.numpy as jnp
from jax import lax
from jax.experimental import pallas as pl
from jax.experimental.pallas import tpu as pltpu


# ----------------------------------------------------------------------------
# Kernel 1: fused Q/K/V projection for all heads (one matmul per x tile).
# ----------------------------------------------------------------------------
def _qkv_proj_kernel(x_ref, w_ref, q_ref, k_ref, v_ref, *, inner):
    # x_ref: (TN, Dq)   w_ref: (Dq, 3*inner)   q/k/v_ref: (TN, inner)
    x = x_ref[...]
    qkv = jnp.dot(x, w_ref[...], preferred_element_type=jnp.float32)
    q_ref[...] = qkv[:, :inner].astype(q_ref.dtype)
    k_ref[...] = qkv[:, inner:2 * inner].astype(k_ref.dtype)
    v_ref[...] = qkv[:, 2 * inner:].astype(v_ref.dtype)


# ----------------------------------------------------------------------------
# Kernel 2: flash attention with K/V VMEM-resident per (batch, head-group).
# grid = (B, n_head_groups, N // TQ); the q-tile axis is INNERMOST so the
# K/V index_map (constant in that axis) keeps K/V resident across q-tiles.
# No reduction axis in the grid -> all axes "parallel"; per-step state
# (m/l/acc scratch) is fully re-initialized every grid step.
# ----------------------------------------------------------------------------
def _flash_attn_kernel(q_ref, k_ref, v_ref, o_ref, m_sc, l_sc, acc_sc,
                       *, dim_head, group, kv_chunk, n_kv, approx_recip):
    # q_ref: (TQ, G*dh)  k_ref/v_ref: (N, G*dh)  o_ref: (TQ, G*dh)
    m_sc[...] = jnp.full_like(m_sc, -jnp.inf)
    l_sc[...] = jnp.zeros_like(l_sc)
    acc_sc[...] = jnp.zeros_like(acc_sc)

    q = q_ref[...]                        # softmax scale already folded into Wq

    @pl.loop(0, n_kv)
    def _kv_step(c):
        start = pl.multiple_of(c * kv_chunk, kv_chunk)
        k = k_ref[pl.ds(start, kv_chunk), :]          # (TKV, G*dh), VMEM only
        v = v_ref[pl.ds(start, kv_chunk), :]
        for h in range(group):                        # static, small (e.g. 2)
            sl = slice(h * dim_head, (h + 1) * dim_head)
            # sim tile (TQ, TKV) in f32; contract over dh (k kept row-major,
            # same dimension_numbers as the reference TPU flash kernel).
            s = lax.dot_general(q[:, sl], k[:, sl],
                                dimension_numbers=(((1,), (1,)), ((), ())),
                                preferred_element_type=jnp.float32)
            m_prev = m_sc[h]                          # (TQ, 1)
            m_new = jnp.maximum(m_prev, jnp.max(s, axis=-1, keepdims=True))
            alpha = jnp.exp(m_prev - m_new)
            p = jnp.exp(s - m_new)
            l_sc[h] = alpha * l_sc[h] + jnp.sum(p, axis=-1, keepdims=True)
            acc_sc[h] = alpha * acc_sc[h] + jnp.dot(
                p.astype(v.dtype), v[:, sl], preferred_element_type=jnp.float32)
            m_sc[h] = m_new

    # Normalize and emit the '(h d)' slice for this head group in one
    # lane-dense store (no per-head partial stores).
    outs = []
    for h in range(group):
        if approx_recip:
            inv_l = pl.reciprocal(l_sc[h], approx=True)   # EUP slot, ~free
        else:
            inv_l = 1.0 / l_sc[h]                         # exact-parity path
        outs.append(acc_sc[h] * inv_l)
    o_ref[...] = jnp.concatenate(outs, axis=-1).astype(o_ref.dtype)


# ----------------------------------------------------------------------------
# Kernel 3: output projection y = attn @ Wo^T + bo  (full K=inner contraction).
# ----------------------------------------------------------------------------
def _out_proj_kernel(a_ref, w_ref, b_ref, o_ref):
    # a_ref: (TN, inner)  w_ref: (inner, Dq)  b_ref: (1, Dq)  o_ref: (TN, Dq)
    y = jnp.dot(a_ref[...], w_ref[...], preferred_element_type=jnp.float32)
    o_ref[...] = (y + b_ref[...].astype(jnp.float32)).astype(o_ref.dtype)


# ----------------------------------------------------------------------------
# Tiling helpers
# ----------------------------------------------------------------------------
def _pick_tile(n, target):
    """Largest tile <= target that divides n and is a multiple of 8, else n."""
    if n <= target:
        return n
    t = (target // 8) * 8
    while t >= 8:
        if n % t == 0:
            return t
        t -= 8
    return n


def _pick_head_group(heads, dim_head):
    """Smallest head group with lane-dense (multiple-of-128) width, else all heads."""
    for g in range(1, heads + 1):
        if heads % g == 0 and (g * dim_head) % 128 == 0:
            return g
    return heads


# ----------------------------------------------------------------------------
# Wrapper
# ----------------------------------------------------------------------------
def cross_attention_forward(x, params, *, heads, dim_head,
                            q_tile=512, kv_chunk=512, n_tile=256,
                            compute_dtype=None, approx_recip=True,
                            vmem_limit_bytes=None):
    """x: (B, N, query_dim). Self-attention (context=None), mask=None.

    compute_dtype: dtype for all matmul operands (f32 accumulation is always
    used).  Pass jnp.bfloat16 for inference on v6e/v7x.
    """
    B, N, Dq = x.shape
    inner = heads * dim_head
    scale = dim_head ** (-0.5)
    out_dtype = x.dtype
    cdt = compute_dtype if compute_dtype is not None else x.dtype
    x = x.astype(cdt)

    # PyTorch Linear stores W as (out, in) and applies x @ W^T -> pre-transpose.
    # Softmax scale folded into Wq; all three projections fused into one weight.
    w_qkv = jnp.concatenate(
        [params["wq"].T * scale, params["wk"].T, params["wv"].T], axis=1
    ).astype(cdt)                                          # (Dq, 3*inner)
    wo_t = params["wo"].T.astype(cdt)                      # (inner, Dq)
    bo = params["bo"].reshape(1, Dq).astype(jnp.float32)   # (1, Dq)

    tn = _pick_tile(N, n_tile)
    tq = _pick_tile(N, q_tile)
    tkv = _pick_tile(N, kv_chunk)
    n_kv = N // tkv
    g = _pick_head_group(heads, dim_head)
    gd = g * dim_head
    n_hg = heads // g

    cp_kwargs = {}
    if vmem_limit_bytes is not None:
        cp_kwargs["vmem_limit_bytes"] = vmem_limit_bytes

    # ---- Kernel 1: fused Q/K/V projection (lane-dense outputs) ----
    q, k, v = pl.pallas_call(
        partial(_qkv_proj_kernel, inner=inner),
        out_shape=(jax.ShapeDtypeStruct((B, N, inner), cdt),) * 3,
        grid=(B, N // tn),
        in_specs=[
            pl.BlockSpec((None, tn, Dq), lambda b, i: (b, i, 0)),
            pl.BlockSpec((Dq, 3 * inner), lambda b, i: (0, 0)),   # resident
        ],
        out_specs=(
            pl.BlockSpec((None, tn, inner), lambda b, i: (b, i, 0)),
            pl.BlockSpec((None, tn, inner), lambda b, i: (b, i, 0)),
            pl.BlockSpec((None, tn, inner), lambda b, i: (b, i, 0)),
        ),
        compiler_params=pltpu.CompilerParams(
            dimension_semantics=("parallel", "parallel"), **cp_kwargs),
    )(x, w_qkv)

    # ---- Kernel 2: flash attention, K/V resident per (batch, head-group) ----
    # NOTE: the q-tile axis must stay innermost so the constant-in-qi K/V
    # index_map keeps K/V in VMEM across q-tiles (perf, not correctness).
    attn = pl.pallas_call(
        partial(_flash_attn_kernel, dim_head=dim_head, group=g,
                kv_chunk=tkv, n_kv=n_kv, approx_recip=approx_recip),
        out_shape=jax.ShapeDtypeStruct((B, N, inner), cdt),
        grid=(B, n_hg, N // tq),
        in_specs=[
            pl.BlockSpec((None, tq, gd), lambda b, hg, qi: (b, qi, hg)),
            pl.BlockSpec((None, N, gd), lambda b, hg, qi: (b, 0, hg)),
            pl.BlockSpec((None, N, gd), lambda b, hg, qi: (b, 0, hg)),
        ],
        out_specs=pl.BlockSpec((None, tq, gd), lambda b, hg, qi: (b, qi, hg)),
        scratch_shapes=[
            pltpu.VMEM((g, tq, 1), jnp.float32),         # running max
            pltpu.VMEM((g, tq, 1), jnp.float32),         # running denominator
            pltpu.VMEM((g, tq, dim_head), jnp.float32),  # output accumulator
        ],
        compiler_params=pltpu.CompilerParams(
            dimension_semantics=("parallel", "parallel", "parallel"),
            **cp_kwargs),
    )(q, k, v)

    # ---- Kernel 3: output projection + bias ----
    y = pl.pallas_call(
        _out_proj_kernel,
        out_shape=jax.ShapeDtypeStruct((B, N, Dq), out_dtype),
        grid=(B, N // tn),
        in_specs=[
            pl.BlockSpec((None, tn, inner), lambda b, i: (b, i, 0)),
            pl.BlockSpec((inner, Dq), lambda b, i: (0, 0)),       # resident
            pl.BlockSpec((1, Dq), lambda b, i: (0, 0)),
        ],
        out_specs=pl.BlockSpec((None, tn, Dq), lambda b, i: (b, i, 0)),
        compiler_params=pltpu.CompilerParams(
            dimension_semantics=("parallel", "parallel"), **cp_kwargs),
    )(attn, wo_t, bo)

    # Dropout(p=0.0) is identity in eval mode.
    return y


# ----------------------------------------------------------------------------
# Pure-JAX reference for correctness checking.
# ----------------------------------------------------------------------------
def cross_attention_ref(x, params, *, heads, dim_head):
    B, N, Dq = x.shape
    scale = dim_head ** (-0.5)
    q = x @ params["wq"].T
    k = x @ params["wk"].T
    v = x @ params["wv"].T

    def split(t):  # 'b n (h d) -> (b h) n d'
        return t.reshape(B, N, heads, dim_head).transpose(0, 2, 1, 3).reshape(
            B * heads, N, dim_head)

    q, k, v = split(q), split(k), split(v)
    sim = jnp.einsum("bid,bjd->bij", q, k) * scale
    p = jax.nn.softmax(sim, axis=-1)
    out = jnp.einsum("bij,bjd->bid", p, v)
    out = out.reshape(B, heads, N, dim_head).transpose(0, 2, 1, 3).reshape(
        B, N, heads * dim_head)
    return out @ params["wo"].T + params["bo"]


if __name__ == "__main__":
    # Small shapes that still exercise multiple q-tiles, multiple KV chunks,
    # and >1 head group (g*dh = 128).  Production SD: N~4096, Dq~320, 16x64.
    B, N = 2, 64
    query_dim = 32
    heads, dim_head = 4, 64
    inner_dim = heads * dim_head

    key = jax.random.PRNGKey(0)
    kx, kq, kk, kv, kw, kb = jax.random.split(key, 6)

    x = jax.random.normal(kx, (B, N, query_dim), dtype=jnp.float32)
    params = {
        # PyTorch Linear weight layout: (out_features, in_features)
        "wq": jax.random.normal(kq, (inner_dim, query_dim), jnp.float32) * 0.05,
        "wk": jax.random.normal(kk, (inner_dim, query_dim), jnp.float32) * 0.05,
        "wv": jax.random.normal(kv, (inner_dim, query_dim), jnp.float32) * 0.05,
        "wo": jax.random.normal(kw, (query_dim, inner_dim), jnp.float32) * 0.05,
        "bo": jax.random.normal(kb, (query_dim,), jnp.float32) * 0.05,
    }

    # Small tiles here purely to exercise the tiling / in-kernel KV loop paths;
    # production uses the q_tile=512 / kv_chunk=512 defaults (bf16 inputs).
    y = cross_attention_forward(x, params, heads=heads, dim_head=dim_head,
                                q_tile=32, kv_chunk=32, n_tile=32)
    y = jax.block_until_ready(y)

    y_ref = cross_attention_ref(x, params, heads=heads, dim_head=dim_head)
    assert y.shape == (B, N, query_dim)
    # approx (EUP) reciprocal in the softmax finalize -> ~1e-3 relative error;
    # pass approx_recip=False for exact parity.
    assert jnp.allclose(y, y_ref, atol=1e-2, rtol=1e-2), "mismatch vs reference"

    print("KERNEL_OK")
</pallas_src>

<mosaic_0001>
module attributes {stable_mosaic.version = 11 : i64} {
  func.func @_qkv_proj_kernel(%arg0: i32, %arg1: i32, %arg2: memref<1x32x32xf32, #tpu.memory_space<vmem>>, %arg3: memref<32x768xf32, #tpu.memory_space<vmem>>, %arg4: memref<1x32x256xf32, #tpu.memory_space<vmem>>, %arg5: memref<1x32x256xf32, #tpu.memory_space<vmem>>, %arg6: memref<1x32x256xf32, #tpu.memory_space<vmem>>) attributes {dimension_semantics = [#tpu.dimension_semantics<parallel>, #tpu.dimension_semantics<parallel>], iteration_bounds = array<i64: 2, 2>, scalar_prefetch = 0 : i64, scratch_operands = 0 : i64, tpu.core_type = #tpu.core_type<tc>, window_params = [{transform_indices = @transform_0, window_bounds = array<i64: 1, 32, 32>}, {pipeline_mode = #tpu.pipeline_mode<synchronous>, transform_indices = @transform_1, window_bounds = array<i64: 32, 768>}, {transform_indices = @transform_2, window_bounds = array<i64: 1, 32, 256>}, {transform_indices = @transform_3, window_bounds = array<i64: 1, 32, 256>}, {transform_indices = @transform_4, window_bounds = array<i64: 1, 32, 256>}]} {
    %c0 = arith.constant 0 : index
    %c0_0 = arith.constant 0 : index
    %c0_1 = arith.constant 0 : index
    %0 = vector.load %arg2[%c0, %c0_0, %c0_1] : memref<1x32x32xf32, #tpu.memory_space<vmem>>, vector<1x32x32xf32>
    %1 = vector.shape_cast %0 : vector<1x32x32xf32> to vector<32x32xf32>
    %c0_2 = arith.constant 0 : index
    %c0_3 = arith.constant 0 : index
    %2 = vector.load %arg3[%c0_2, %c0_3] : memref<32x768xf32, #tpu.memory_space<vmem>>, vector<32x768xf32>
    %cst = arith.constant dense<0.000000e+00> : vector<32x768xf32>
    %3 = tpu.matmul %1, %2, %cst {dimension_numbers = #tpu.dot_dimension_numbers<[1], [0], [0], [1], [0, 0, 1, 1], [], []>} : vector<32x32xf32>, vector<32x768xf32>, vector<32x768xf32> -> vector<32x768xf32>
    %4 = vector.extract_strided_slice %3 {offsets = [0, 0], sizes = [32, 256], strides = [1, 1]} : vector<32x768xf32> to vector<32x256xf32>
    %c0_4 = arith.constant 0 : index
    %c0_5 = arith.constant 0 : index
    %c0_6 = arith.constant 0 : index
    %5 = vector.load %arg4[%c0_4, %c0_5, %c0_6] : memref<1x32x256xf32, #tpu.memory_space<vmem>>, vector<1x32x256xf32>
    %6 = vector.shape_cast %5 : vector<1x32x256xf32> to vector<32x256xf32>
    %7 = vector.shape_cast %4 : vector<32x256xf32> to vector<1x32x256xf32>
    tpu.vector_store %arg4[%c0_4, %c0_5, %c0_6], %7 {strides = array<i32>} : memref<1x32x256xf32, #tpu.memory_space<vmem>>, vector<1x32x256xf32>,
    %8 = vector.extract_strided_slice %3 {offsets = [0, 256], sizes = [32, 256], strides = [1, 1]} : vector<32x768xf32> to vector<32x256xf32>
    %c0_7 = arith.constant 0 : index
    %c0_8 = arith.constant 0 : index
    %c0_9 = arith.constant 0 : index
    %9 = vector.load %arg5[%c0_7, %c0_8, %c0_9] : memref<1x32x256xf32, #tpu.memory_space<vmem>>, vector<1x32x256xf32>
    %10 = vector.shape_cast %9 : vector<1x32x256xf32> to vector<32x256xf32>
    %11 = vector.shape_cast %8 : vector<32x256xf32> to vector<1x32x256xf32>
    tpu.vector_store %arg5[%c0_7, %c0_8, %c0_9], %11 {strides = array<i32>} : memref<1x32x256xf32, #tpu.memory_space<vmem>>, vector<1x32x256xf32>,
    %12 = vector.extract_strided_slice %3 {offsets = [0, 512], sizes = [32, 256], strides = [1, 1]} : vector<32x768xf32> to vector<32x256xf32>
    %c0_10 = arith.constant 0 : index
    %c0_11 = arith.constant 0 : index
    %c0_12 = arith.constant 0 : index
    %13 = vector.load %arg6[%c0_10, %c0_11, %c0_12] : memref<1x32x256xf32, #tpu.memory_space<vmem>>, vector<1x32x256xf32>
    %14 = vector.shape_cast %13 : vector<1x32x256xf32> to vector<32x256xf32>
    %15 = vector.shape_cast %12 : vector<32x256xf32> to vector<1x32x256xf32>
    tpu.vector_store %arg6[%c0_10, %c0_11, %c0_12], %15 {strides = array<i32>} : memref<1x32x256xf32, #tpu.memory_space<vmem>>, vector<1x32x256xf32>,
    return
  }
  func.func @transform_0(%arg0: i32, %arg1: i32) -> (i32, i32, i32) {
    %c0_i32 = arith.constant 0 : i32
    %c0_i32_0 = arith.constant 0 : i32
    return %arg0, %arg1, %c0_i32 : i32, i32, i32
  }
  func.func @transform_1(%arg0: i32, %arg1: i32) -> (i32, i32) {
    %c0_i32 = arith.constant 0 : i32
    %c0_i32_0 = arith.constant 0 : i32
    %c0_i32_1 = arith.constant 0 : i32
    return %c0_i32, %c0_i32_0 : i32, i32
  }
  func.func @transform_2(%arg0: i32, %arg1: i32) -> (i32, i32, i32) {
    %c0_i32 = arith.constant 0 : i32
    %c0_i32_0 = arith.constant 0 : i32
    return %arg0, %arg1, %c0_i32 : i32, i32, i32
  }
  func.func @transform_3(%arg0: i32, %arg1: i32) -> (i32, i32, i32) {
    %c0_i32 = arith.constant 0 : i32
    %c0_i32_0 = arith.constant 0 : i32
    return %arg0, %arg1, %c0_i32 : i32, i32, i32
  }
  func.func @transform_4(%arg0: i32, %arg1: i32) -> (i32, i32, i32) {
    %c0_i32 = arith.constant 0 : i32
    %c0_i32_0 = arith.constant 0 : i32
    return %arg0, %arg1, %c0_i32 : i32, i32, i32
  }
}

</mosaic_0001>

<bundles_post_ra>
// kernel: tpu_custom_call.1
= control target key start
LH: loop header
LB: loop body
LE: loop exit
PB: predicated region body
PF: predicated region fallthrough
CT: control target
= control target key end

     0   :  { %10 = vsyncpa [#allocation3], 0  ;;  %s1486_s0 = inlined_call_operand.vmem [shape: f32[2,64,32], index: 0, kind: input, shape index: {}]   ;;  %s1487_s1 = inlined_call_operand.vmem [shape: f32[32,768], index: 1, kind: input, shape index: {}]   ;;  %s1488_s2 = inlined_call_operand.hbm [shape: f32[2,64,256], index: 2, kind: output, shape index: {0}]   ;;  %s1489_s3 = inlined_call_operand.hbm [shape: f32[2,64,256], index: 3, kind: output, shape index: {1}]   ;;  %s1490_s4 = inlined_call_operand.hbm [shape: f32[2,64,256], index: 4, kind: output, shape index: {2}]  }
   0x1   :  { %12 = vsyncpa [#allocation3 + $0x1], 0 }
   0x2   :  { %13 = vsyncpa [#allocation5], 0 }
   0x3   :  { %15 = vsyncpa [#allocation5 + $0x1], 0  ;;  %s1139_s15 = smov 0   ;;  %s1141_s16 = smov 0  }
   0x4   :  { %s1143_s17 = smov 0   ;;  %s1145_s18 = smov 0  }
   0x5   :  { %s1147_s19 = smov 0   ;;  %s1149_s20 = smov 0  }
   0x6   :  { %s1151_s21 = smov 0   ;;  %s1153_s22 = smov 0  }
   0x7 LB: > { %s1492_s23 = sadd.s32 4294967295, %s1106_s22   ;;  %s1491_s24 = sadd.s32 4294967294, %s1106_s22   ;;  %s1106_s22 = sphi %s1153_s22, %s21_s22   ;;  %s1102_s21 = sphi %s1151_s21, %s1509_s21   ;;  %s1098_s20 = sphi %s1149_s20, %s1508_s20   ;;  %s1094_s19 = sphi %s1147_s19, %s1507_s19   ;;  %s1090_s18 = sphi %s1145_s18, %s1506_s18   ;;  %s1086_s17 = sphi %s1143_s17, %s1505_s17   ;;  %s1082_s16 = sphi %s1141_s16, %s1504_s16   ;;  %s1078_s15 = sphi %s1139_s15, %s1503_s15  }
   0x8   : > { %s30_s25 = sadd.s32 1, %s1098_s20  ;;  %s33_s26 = sadd.s32 1, %s1102_s21 }
   0x9   : > { %p31_p0 = scmp.ge.s32.totalorder %s30_s25, 2  ;;  %p101_p1 = scmp.ne.s32.totalorder %s1086_s17, %s1082_s16 }
   0xa   : > { %p102_p2 = scmp.eq.s32.totalorder %s1492_s23, 3  ;;  %p107_p5 = scmp.ne.s32.totalorder %s1082_s16, %s1078_s15 }
   0xb   : > { %s1511_s25 = smov (%p31_p0, %s30_s25), 0  ;;  %s1513_s26 = smov (!%p31_p0, %s33_s26), %s1102_s21 }
   0xc   : > { %s87_s27 = ssub.s32 %s1098_s20, %s1511_s25  ;;  %p1192_p3 = por %p102_p2, %p101_p1 }
   0xd   : > { %p35_p4 = scmp.ge.s32.totalorder %s1513_s26, 2  ;;  %p108_p6 = scmp.eq.s32.totalorder %s1491_s24, 3 }
   0xe   : > { %p801_p7 = scmp.ge.s32.totalorder %s1106_s22, 1  ;;  %p198_p9 = scmp.lt.s32.totalorder %s1106_s22, 5 }
   0xf   : > { %s1515_s26 = smov (%p35_p4, %s1513_s26), 0  ;;  %p1203_p8 = por %p108_p6, %p107_p5 }
  0x10   : > { %1497 = sst [smem:[#allocation9_spill]] %s1515_s26  ;;  %s86_s30 = ssub.s32 %s1102_s21, %s1515_s26 }
  0x11   : > { %s91_s5 = sadd.s32 1, %s1086_s17  ;;  %s88_s6 = sor.u32 %s87_s27, %s86_s30 }
  0x12   : > { %p199_p10 = pnand %p801_p7, %p198_p9  ;;  %p89_p11 = scmp.eq.s32.totalorder %s88_s6, 0 }
  0x13   : > { %v256_v0 = vld [vmem:[%s1487_s1 + $0x8] sm:$0xff] (!%p199_p10)  ;;  %v262_v1 = vld [vmem:[%s1487_s1 + $0x38] sm:$0xff] (!%p199_p10)  ;;  %v255_v2 = vld [vmem:[%s1487_s1] sm:$0xff] (!%p199_p10)  ;;  %s805_s14 = sshll.u32 (!%p199_p10), %s1090_s18, 2  ;;  %p239_p12 = scmp.lt.s32.totalorder (!%p199_p10), %s1094_s19, 1  ;;  %v1108_v7 = vmov (!%p199_p10), 0.0  }
  0x14   : > { %s1212_s7 = scalar_select %p89_p11, %s1086_s17, %s91_s5  }
  0x15   : > { %202 = sbr.rel (%p199_p10) target bundleno = 317 (0x13d), region = 28  ;;  %v840_v3 = vpack.c.bf16 (!%p199_p10), %v262_v1, %v256_v0  ;;  %v261_v4 = vld [vmem:[%s1487_s1 + $0x30] sm:$0xff] (!%p199_p10)  ;;  %v268_v5 = vld [vmem:[%s1487_s1 + $0x68] sm:$0xff] (!%p199_p10)  ;;  %v274_v6 = vld [vmem:[%s1487_s1 + $0x98] sm:$0xff] (!%p199_p10)  ;;  %368 = vmatprep.mubr.f32.mxu1 (!%p199_p10), %v1108_v7  ;;  %356 = vmatprep.mubr.f32.mxu0 (!%p199_p10), %v1108_v7  ;;  %p241_p13 = scmp.lt.s32.totalorder (!%p199_p10), %s805_s14, 7  ;;  %vm279_vm0 = vcmask (!%p199_p10), 261120  }
  0x16   : > { %v842_v8 = vpack.c.bf16 (!%p199_p10), %v261_v4, %v255_v2  ;;  %v844_v9 = vpack.c.bf16 (!%p199_p10), %v274_v6, %v268_v5  ;;  %v267_v10 = vld [vmem:[%s1487_s1 + $0x60] sm:$0xff] (!%p199_p10)  ;;  %v273_v11 = vld [vmem:[%s1487_s1 + $0x90] sm:$0xff] (!%p199_p10)  ;;  %v258_v12 = vld [vmem:[%s1487_s1 + $0x18] sm:$0xff] (!%p199_p10)  ;;  %s837_s8 = sshll.u32 (!%p199_p10), %s1090_s18, 3  ;;  %s1109_s5 = smov (!%p199_p10), [#allocation2]  }
  0x17   : > { %864 = vmatprep.subr.bf16.mxu1 (!%p199_p10), %v840_v3  ;;  %841 = vmatprep.subr.bf16.mxu0 (!%p199_p10), %v840_v3  ;;  %v264_v13 = vld [vmem:[%s1487_s1 + $0x48] sm:$0xff] (!%p199_p10)  ;;  %v846_v14 = vpack.c.bf16 (!%p199_p10), %v273_v11, %v267_v10  ;;  %v257_v15 = vld [vmem:[%s1487_s1 + $0x10] sm:$0xff] (!%p199_p10)  ;;  %v266_v17 = vld [vmem:[%s1487_s1 + $0x58] sm:$0xff] (!%p199_p10) }
  0x18   : > { %866 = vmatpush1.bf16.msra.mxu1 (!%p199_p10), %v842_v8  ;;  %843 = vmatpush1.bf16.msra.mxu0 (!%p199_p10), %v842_v8  ;;  %v260_v16 = vld [vmem:[%s1487_s1 + $0x28] sm:$0xff] (!%p199_p10)  ;;  %v848_v18 = vpack.c.bf16 (!%p199_p10), %v264_v13, %v258_v12  ;;  %v263_v19 = vld [vmem:[%s1487_s1 + $0x40] sm:$0xff] (!%p199_p10)  ;;  %v265_v22 = vld [vmem:[%s1487_s1 + $0x50] sm:$0xff] (!%p199_p10) }
  0x19   : > { %865 = vmatprep.subr.bf16.mxu1 (!%p199_p10), %v844_v9  ;;  %845 = vmatprep.subr.bf16.mxu0 (!%p199_p10), %v844_v9  ;;  %v856_v20 = vpack.c.bf16 (!%p199_p10), %v266_v17, %v260_v16  ;;  %v259_v21 = vld [vmem:[%s1487_s1 + $0x20] sm:$0xff] (!%p199_p10)  ;;  %v270_v23 = vld [vmem:[%s1487_s1 + $0x78] sm:$0xff] (!%p199_p10)  ;;  %v276_v24 = vld [vmem:[%s1487_s1 + $0xa8] sm:$0xff] (!%p199_p10)  ;;  %v850_v29 = vpack.c.bf16 (!%p199_p10), %v263_v19, %v257_v15 }
  0x1a   : > { %v272_v25 = vld [vmem:[%s1487_s1 + $0x88] sm:$0xff] (!%p199_p10)  ;;  %v278_v26 = vld [vmem:[%s1487_s1 + $0xb8] sm:$0xff] (!%p199_p10)  ;;  %v858_v30 = vpack.c.bf16 (!%p199_p10), %v265_v22, %v259_v21  ;;  %v269_v31 = vld [vmem:[%s1487_s1 + $0x70] sm:$0xff] (!%p199_p10)  ;;  %v852_v35 = vpack.c.bf16 (!%p199_p10), %v276_v24, %v270_v23 }
  0x1b   : > { %v275_v32 = vld [vmem:[%s1487_s1 + $0xa0] sm:$0xff] (!%p199_p10)  ;;  %v277_v34 = vld [vmem:[%s1487_s1 + $0xb0] sm:$0xff] (!%p199_p10)  ;;  %v860_v36 = vpack.c.bf16 (!%p199_p10), %v278_v26, %v272_v25 }
  0x1c   : > { %s240_s27 = scalar_select %p239_p12, %s1094_s19, 1  ;;  %867 = vmatpush1.bf16.msra.mxu1 %v846_v14  ;;  %847 = vmatpush1.bf16.msra.mxu0 %v846_v14  ;;  %v271_v33 = vld [vmem:[%s1487_s1 + $0x80] sm:$0xff]  ;;  %v854_v39 = vpack.c.bf16 %v275_v32, %v269_v31 }
  0x1d   : > { %s1517_s14 = smov (!%p241_p13, %s805_s14), 7  ;;  %849 = vmatprep.subr.bf16.mxu1 %v848_v18  ;;  %857 = vmatprep.subr.bf16.mxu0 %v856_v20  ;;  %v862_v40 = vpack.c.bf16 %v277_v34, %v271_v33 }
  0x1e   : > { %s806_s9 = sshll.u32 %s240_s27, 3  ;;  %s825_s27 = sshll.u32 %s1094_s19, 4 }
  0x1f   : > { %s244_s6 = sadd.s32 %s806_s9, %s1517_s14  ;;  %s607_s10 = sadd.s32 %s837_s8, %s825_s27 }
  0x20   : > { %s807_s13 = sshll.u32 %s244_s6, 3  ;;  %s1322_s12 = sshll.u32 %s607_s10, 7 }
  0x21   : > { %s246_s23 = scalar_lea.vmem %s1486_s0, %s807_s13  ;;  %s1330_s13 = scalar_lea.hbm %s1488_s2, %s1322_s12 }
  0x22   : > { %v253_v27 = vld [vmem:[%s246_s23 + $0x10] sm:$0xff]  ;;  %v251_v28 = vld [vmem:[%s246_s23] sm:$0xff]  ;;  %v254_v37 = vld [vmem:[%s246_s23 + $0x18] sm:$0xff]  ;;  %s956_s14 = sshll.u32 %s1109_s5, 4  ;;  %s957_s14 = int_to_ptr.vmem [resolvable:$false] %s956_s14 }
  0x23   : > { %810 = vmatmul.mubr.msk.f32.vlgmr.msra.gmra.mrb[0].mxu1 %vm279_vm0, %v253_v27  ;;  %808 = vmatmul.mubr.msk.f32.vlgmr.msra.gmra.mrb[0].mxu0 %vm279_vm0, %v251_v28  ;;  %v252_v38 = vld [vmem:[%s246_s23 + $0x8] sm:$0xff]  ;;  %s221_s23 = sand.u32 1, %s1082_s16   ;;  %s958_s9 = scalar_lea.vmem %s957_s14, 2048 }
  0x24   : > { %851 = vmatpush1.bf16.msra.mxu1 %v850_v29  ;;  %859 = vmatpush1.bf16.msra.mxu0 %v858_v30  ;;  %s1317_s24 = sshll.u32 %s221_s23, 6  ;;  %s1332_s26 = scalar_lea.sflag [#allocation3], %s221_s23 }
  0x25   : > { %374 = vmatprep.mubr.f32.mxu1 %v1108_v7  ;;  %362 = vmatprep.mubr.f32.mxu0 %v1108_v7  ;;  %s223_s11 = scalar_lea.vmem [#allocation2], %s1317_s24 }
  0x26   : > { %853 = vmatprep.subr.bf16.mxu1 %v852_v35  ;;  %861 = vmatprep.subr.bf16.mxu0 %v860_v36  ;;  %s610_s6 = sshll.u32 %s223_s11, 4  ;;  %s1324_s6 = int_to_ptr.vmem [resolvable:$true] %s610_s6 }
  0x27   : > { %811 = vmatmul.mubr.msk.f32.gmra.mrb[2].mxu1 %vm279_vm0, %v254_v37  ;;  %809 = vmatmul.mubr.msk.f32.gmra.mrb[2].mxu0 %vm279_vm0, %v252_v38  ;;  %s952_s30 = scalar_lea.vmem %s1324_s6, 1024  ;;  %p959_p4 = scmp.lt.s32.totalorder %s1324_s6, %s957_s14 }
  0x28   : > { %855 = vmatpush1.bf16.msra.mxu1 %v854_v39  ;;  %863 = vmatpush1.bf16.msra.mxu0 %v862_v40  ;;  %p953_p0 = scmp.ne.s32.totalorder %s1324_s6, %s952_s30  ;;  %p960_p5 = scmp.lt.s32.totalorder %s958_s9, %s952_s30 }
  0x29   : > { %445 = vmatprep.mubr.f32.mxu1 %v1108_v7  ;;  %534 = vmatprep.mubr.f32.mxu0 %v1108_v7 }
  0x2a   : > { %p954_p1 = pnand %p953_p0, %p1192_p3  ;;  %p961_p6 = por %p960_p5, %p959_p4 }
  0x2b   : > { %812 = vmatmul.mubr.msk.f32.vlgmr.msra.gmra.mrb[4].mxu1 %vm279_vm0, %v251_v28  ;;  %816 = vmatmul.mubr.msk.f32.vlgmr.msra.gmra.mrb[4].mxu0 %vm279_vm0, %v251_v28 }
  0x2c   : > { %451 = vmatprep.mubr.f32.mxu1 %v1108_v7  ;;  %540 = vmatprep.mubr.f32.mxu0 %v1108_v7  ;;  %p955_p2 = pneg %p954_p1 }
  0x2e   : > { %p962_p7 = pnand %p961_p6, %p955_p2 }
  0x2f   : > { %813 = vmatmul.mubr.msk.f32.gmra.mrb[6].mxu1 %vm279_vm0, %v252_v38  ;;  %817 = vmatmul.mubr.msk.f32.gmra.mrb[6].mxu0 %vm279_vm0, %v252_v38 }
  0x30   : > { %457 = vmatprep.mubr.f32.mxu1 %v1108_v7  ;;  %546 = vmatprep.mubr.f32.mxu0 %v1108_v7 }
  0x33   : > { %814 = vmatmul.mubr.msk.f32.gmra.mrb[8].mxu1 %vm279_vm0, %v253_v27  ;;  %818 = vmatmul.mubr.msk.f32.gmra.mrb[8].mxu0 %vm279_vm0, %v253_v27 }
  0x34   : > { %463 = vmatprep.mubr.f32.mxu1 %v1108_v7  ;;  %552 = vmatprep.mubr.f32.mxu0 %v1108_v7 }
  0x37   : > { %815 = vmatmul.mubr.msk.f32.gmra.mrb[10].mxu1 %vm279_vm0, %v254_v37  ;;  %819 = vmatmul.mubr.msk.f32.gmra.mrb[10].mxu0 %vm279_vm0, %v254_v37 }
  0xf6   : > { %v370_v41 = vpop.f32.mrb[0].mxu1  ;;  %v358_v42 = vpop.f32.mrb[0].mxu0 }
  0xf7   : > { %563 = vst [vmem:[%s223_s11 + $0x20] sm:$0xff] %v370_v41  ;;  %559 = vst [vmem:[%s223_s11] sm:$0xff] %v358_v42  ;;  %v372_v43 = vpop.f32.mrb[1].mxu1  ;;  %v360_v44 = vpop.f32.mrb[1].mxu0 }
  0xf8   : > { %564 = vst [vmem:[%s223_s11 + $0x28] sm:$0xff] %v372_v43  ;;  %560 = vst [vmem:[%s223_s11 + $0x8] sm:$0xff] %v360_v44 }
  0xfa   : > { %v376_v45 = vpop.f32.mrb[2].mxu1  ;;  %v364_v46 = vpop.f32.mrb[2].mxu0 }
  0xfb   : > { %565 = vst [vmem:[%s223_s11 + $0x30] sm:$0xff] %v376_v45  ;;  %561 = vst [vmem:[%s223_s11 + $0x10] sm:$0xff] %v364_v46  ;;  %v378_v47 = vpop.f32.mrb[3].mxu1  ;;  %v366_v48 = vpop.f32.mrb[3].mxu0 }
  0xfc   : > { %566 = vst [vmem:[%s223_s11 + $0x38] sm:$0xff] %v378_v47  ;;  %562 = vst [vmem:[%s223_s11 + $0x18] sm:$0xff] %v366_v48 }
  0xfd   : > { %965 = shalt.err (!%p962_p7)
}
  0xfe   : > { %s966_s23 = scalar_lea.hbm %s1330_s13, 1024  ;;  %s970_s10 = scalar_lea.hbm %s1488_s2, 4096 }
  0xff   : > { %p967_p9 = scmp.ne.s32.totalorder %s1330_s13, %s966_s23  ;;  %p971_p12 = scmp.lt.u32.totalorder %s1330_s13, %s1488_s2 }
 0x100   : > { %p972_p13 = scmp.lt.u32.totalorder %s970_s10, %s966_s23  ;;  %p974_p1 = scmp.lt.u32.totalorder %s966_s23, %s1330_s13 }
 0x101   : > { %p968_p10 = pnand %p967_p9, %p1192_p3 }
 0x102   : > { %p973_p0 = por %p972_p13, %p971_p12 }
 0x103   : > { %p969_p11 = pneg %p968_p10 }
 0x104   : > { %p975_p2 = por %p974_p1, %p973_p0 }
 0x106   : > { %p976_p4 = pnand %p975_p2, %p969_p11 }
 0x108   : > { %979 = shalt.err (!%p976_p4)
}
 0x109   : > { %s1494_s19 = smov 256   ;;  %s1111_s30 = smov 16   ;;  %v447_v49 = vpop.f32.mrb[4].mxu1  ;;  %v536_v50 = vpop.f32.mrb[4].mxu0 }
 0x10a   : > { %868 = dma.vmem_to_hbm [thread:$0]  (%p1192_p3), %s1324_s6, 1024, %s1330_s13, %s1332_s26, %s1494_s19, %s1494_s19, %s1111_s30   ;;  %v449_v51 = vpop.f32.mrb[5].mxu1  ;;  %v538_v52 = vpop.f32.mrb[5].mxu0 }
 0x10b   : > { %s1360_s5 = scalar_lea.vmem [#allocation4], %s1317_s24  ;;  %s1364_s14 = scalar_lea.vmem [#allocation6], %s1317_s24  ;;  %v453_v53 = vpop.f32.mrb[6].mxu1  ;;  %v542_v54 = vpop.f32.mrb[6].mxu0 }
 0x10c   : > { %567 = vst [vmem:[%s1360_s5] sm:$0xff] %v447_v49  ;;  %575 = vst [vmem:[%s1364_s14] sm:$0xff] %v536_v50  ;;  %v455_v55 = vpop.f32.mrb[7].mxu1  ;;  %v544_v56 = vpop.f32.mrb[7].mxu0  ;;  %s629_s24 = sshll.u32 %s1360_s5, 4  ;;  %s1499_s6 = sadd.s32 4294967295, %s1106_s22   ;;  %s1383_s24 = int_to_ptr.vmem [resolvable:$true] %s629_s24 }
 0x10d   : > { %568 = vst [vmem:[%s1360_s5 + $0x8] sm:$0xff] %v449_v51  ;;  %576 = vst [vmem:[%s1364_s14 + $0x8] sm:$0xff] %v538_v52  ;;  %v459_v57 = vpop.f32.mrb[8].mxu1  ;;  %v548_v58 = vpop.f32.mrb[8].mxu0  ;;  %s1378_s13 = sand.u32 1, %s1499_s6   ;;  %s648_s26 = sshll.u32 %s1364_s14, 4  ;;  %s1391_s26 = int_to_ptr.vmem [resolvable:$true] %s648_s26 }
 0x10e   : > { %569 = vst [vmem:[%s1360_s5 + $0x10] sm:$0xff] %v453_v53  ;;  %577 = vst [vmem:[%s1364_s14 + $0x10] sm:$0xff] %v542_v54  ;;  %v461_v59 = vpop.f32.mrb[9].mxu1  ;;  %v550_v60 = vpop.f32.mrb[9].mxu0  ;;  %s1389_s8 = scalar_lea.hbm %s1489_s3, %s1322_s12  ;;  %s1399_s11 = scalar_lea.hbm %s1490_s4, %s1322_s12 }
 0x10f   : > { %570 = vst [vmem:[%s1360_s5 + $0x18] sm:$0xff] %v455_v55  ;;  %578 = vst [vmem:[%s1364_s14 + $0x18] sm:$0xff] %v544_v56  ;;  %v465_v61 = vpop.f32.mrb[10].mxu1  ;;  %v554_v62 = vpop.f32.mrb[10].mxu0  ;;  %s589_s18 = scalar_lea.sflag [#allocation5], %s1378_s13  ;;  %s980_s6 = scalar_lea.vmem %s1383_s24, 1024 }
 0x110   : > { %571 = vst [vmem:[%s1360_s5 + $0x20] sm:$0xff] %v459_v57  ;;  %579 = vst [vmem:[%s1364_s14 + $0x20] sm:$0xff] %v548_v58  ;;  %v467_v63 = vpop.f32.mrb[11].mxu1  ;;  %v556_v0 = vpop.f32.mrb[11].mxu0  ;;  %p981_p5 = scmp.ne.s32.totalorder %s1383_s24, %s980_s6  ;;  %s1112_s9 = smov [#allocation4]  }
 0x111   : > { %572 = vst [vmem:[%s1360_s5 + $0x28] sm:$0xff] %v461_v59  ;;  %580 = vst [vmem:[%s1364_s14 + $0x28] sm:$0xff] %v550_v60  ;;  %s984_s23 = sshll.u32 %s1112_s9, 4  ;;  %s985_s23 = int_to_ptr.vmem [resolvable:$false] %s984_s23 }
 0x112   : > { %573 = vst [vmem:[%s1360_s5 + $0x30] sm:$0xff] %v465_v61  ;;  %581 = vst [vmem:[%s1364_s14 + $0x30] sm:$0xff] %v554_v62  ;;  %p982_p6 = pnand %p981_p5, %p1192_p3  ;;  %s986_s19 = scalar_lea.vmem %s985_s23, 2048 }
 0x113   : > { %574 = vst [vmem:[%s1360_s5 + $0x38] sm:$0xff] %v467_v63  ;;  %582 = vst [vmem:[%s1364_s14 + $0x38] sm:$0xff] %v556_v0  ;;  %p987_p9 = scmp.lt.s32.totalorder %s1383_s24, %s985_s23  ;;  %p988_p10 = scmp.lt.s32.totalorder %s986_s19, %s980_s6 }
 0x114   : > { %p983_p7 = pneg %p982_p6 }
 0x115   : > { %p989_p11 = por %p988_p10, %p987_p9 }
 0x117   : > { %p990_p12 = pnand %p989_p11, %p983_p7 }
 0x119   : > { %993 = shalt.err (!%p990_p12)
}
 0x11a   : > { %s994_s12 = scalar_lea.hbm %s1389_s8, 1024  ;;  %s998_s27 = scalar_lea.hbm %s1489_s3, 4096 }
 0x11b   : > { %p995_p13 = scmp.ne.s32.totalorder %s1389_s8, %s994_s12  ;;  %p999_p2 = scmp.lt.u32.totalorder %s1389_s8, %s1489_s3 }
 0x11c   : > { %p1000_p4 = scmp.lt.u32.totalorder %s998_s27, %s994_s12  ;;  %p1002_p6 = scmp.lt.u32.totalorder %s994_s12, %s1389_s8 }
 0x11d   : > { %p996_p0 = pnand %p995_p13, %p1192_p3 }
 0x11e   : > { %p1001_p5 = por %p1000_p4, %p999_p2 }
 0x11f   : > { %p997_p1 = pneg %p996_p0 }
 0x120   : > { %p1003_p7 = por %p1002_p6, %p1001_p5 }
 0x122   : > { %p1004_p9 = pnand %p1003_p7, %p997_p1 }
 0x124   : > { %1007 = shalt.err (!%p1004_p9)
}
 0x125   : > { %s1500_s19 = smov 256   ;;  %s1008_s6 = scalar_lea.vmem %s1391_s26, 1024 }
 0x126   : > { %869 = dma.vmem_to_hbm [thread:$0]  (%p1192_p3), %s1383_s24, 1024, %s1389_s8, %s589_s18, %s1500_s19, %s1500_s19, %s1111_s30  }
 0x127   : > { %p1009_p10 = scmp.ne.s32.totalorder %s1391_s26, %s1008_s6  ;;  %s1113_s23 = smov [#allocation6]  }
 0x128   : > { %s1012_s12 = sshll.u32 %s1113_s23, 4  ;;  %s1013_s12 = int_to_ptr.vmem [resolvable:$false] %s1012_s12 }
 0x129   : > { %p1010_p11 = pnand %p1009_p10, %p1192_p3  ;;  %s1014_s5 = scalar_lea.vmem %s1013_s12, 2048 }
 0x12a   : > { %p1015_p13 = scmp.lt.s32.totalorder %s1391_s26, %s1013_s12  ;;  %p1016_p0 = scmp.lt.s32.totalorder %s1014_s5, %s1008_s6 }
 0x12b   : > { %p1011_p12 = pneg %p1010_p11 }
 0x12c   : > { %p1017_p1 = por %p1016_p0, %p1015_p13 }
 0x12e   : > { %p1018_p2 = pnand %p1017_p1, %p1011_p12 }
 0x130   : > { %1021 = shalt.err (!%p1018_p2)
}
 0x131   : > { %s1022_s24 = scalar_lea.hbm %s1399_s11, 1024  ;;  %s1026_s27 = scalar_lea.hbm %s1490_s4, 4096 }
 0x132   : > { %p1023_p4 = scmp.ne.s32.totalorder %s1399_s11, %s1022_s24  ;;  %p1027_p7 = scmp.lt.u32.totalorder %s1399_s11, %s1490_s4 }
 0x133   : > { %p1028_p9 = scmp.lt.u32.totalorder %s1026_s27, %s1022_s24  ;;  %p1030_p11 = scmp.lt.u32.totalorder %s1022_s24, %s1399_s11 }
 0x134   : > { %p1024_p5 = pnand %p1023_p4, %p1192_p3 }
 0x135   : > { %p1029_p10 = por %p1028_p9, %p1027_p7 }
 0x136   : > { %p1025_p6 = pneg %p1024_p5 }
 0x137   : > { %p1031_p12 = por %p1030_p11, %p1029_p10 }
 0x139   : > { %p1032_p13 = pnand %p1031_p12, %p1025_p6 }
 0x13b   : > { %1035 = shalt.err (!%p1032_p13)
}
 0x13c   : > { %870 = dma.vmem_to_hbm [thread:$0]  (%p1192_p3), %s1391_s26, 1024, %s1399_s11, %s589_s18, %s1500_s19, %s1500_s19, %s1111_s30  }
 0x13d PF: > { %p884_p0 = scmp.ge.s32.totalorder %s1106_s22, 2  ;;  %s663_s6 = sand.u32 1, %s1078_s15  }
 0x13e   : > { %s664_s23 = scalar_lea.sflag [#allocation3], %s663_s6 }
 0x13f   : > { %p875_p1 = pnand %p884_p0, %p1203_p8 }
 0x141   : > { %1069 = dma.done.wait (!%p875_p1), %s664_s23, 1024  }
 0x142   : > { %1071 = vsyncadd (!%p875_p1), %s664_s23, 4294966272  ;;  %s1501_s28 = sadd.s32 4294967294, %s1106_s22  }
 0x143   : > { %s672_s12 = sand.u32 1, %s1501_s28  }
 0x144   : > { %s673_s5 = scalar_lea.sflag [#allocation5], %s672_s12 }
 0x145   : > { %1073 = dma.done.wait (!%p875_p1), %s673_s5, 2048  }
 0x146   : > { %1075 = vsyncadd (!%p875_p1), %s673_s5, 4294965248  ;;  %s21_s22 = sadd.s32 1, %s1106_s22   ;;  %s1502_s29 = sld [smem:[#allocation9_spill]] }
 0x147   : > { %p18_p3 = scmp.ge.s32.totalorder %s21_s22, 6   ;;  %s1503_s15 = smov %s1082_s16 }
 0x148   : > { %s1504_s16 = smov %s1086_s17  ;;  %s1505_s17 = smov %s1212_s7 }
 0x149   : > { %s1506_s18 = smov %s1098_s20  ;;  %s1507_s19 = smov %s1102_s21 }
 0x14a   : > { %s1508_s20 = smov %s1511_s25  ;;  %20 = sbr.rel (!%p18_p3) target bundleno = 7 (0x7), region = 95 }
 0x14c   : > { %s1509_s21 = smov %s1502_s29 }
 0x151   :  { %687 = vsyncpa [#allocation3], 1 }
 0x152   :  { %689 = vsyncpa [#allocation3 + $0x1], 1 }
 0x153   :  { %690 = vsyncpa [#allocation5], 1 }
 0x154   :  { %692 = vsyncpa [#allocation5 + $0x1], 1 }

</bundles_post_ra>
